<compile_context>
chip_gen: v7x
topology: tpu7x:2x2x1
jax: 0.10.0
libtpu: 0.0.40
codegen_flags: <defaults>
</compile_context>

<pallas_src>
import jax
import jax.numpy as jnp
from jax.experimental import pallas as pl
from jax.experimental.pallas import tpu as pltpu


def _round_up(x, m):
    return (x + m - 1) // m * m


def qnet_kernel(s_ref, a_ref, w1s_ref, w1a_ref, b1_ref, w2r_ref, b2_ref, o_ref):
    # s_ref:   (TB, S)      a_ref:  (TB, A)
    # w1s_ref: (S, H)       w1a_ref:(A, H)      b1_ref: (1, H)   (f32)
    # w2r_ref: (1, H)       b2_ref: (1, 1) in SMEM (scalar)
    # o_ref:   (1, TB)      -- batch on the lane axis (lane-dense store)

    # Layer 1: x @ W1 done as state @ W1[:S] + action @ W1[S:]  (no concat).
    h = (
        jnp.dot(s_ref[...], w1s_ref[...], preferred_element_type=jnp.float32)
        + jnp.dot(a_ref[...], w1a_ref[...], preferred_element_type=jnp.float32)
        + b1_ref[...]
    )
    h = jnp.maximum(h, 0.0)  # ReLU in f32

    # Layer 2: w2_row (1,H) contracted against h (TB,H) over H -> (1, TB).
    # MXU output columns are fully used (N = TB) and the result is already
    # lane-dense, so the store below is an unmasked full-lane vst.
    out_row = jax.lax.dot_general(
        w2r_ref[...],
        h.astype(w2r_ref.dtype),
        dimension_numbers=(((1,), (1,)), ((), ())),
        preferred_element_type=jnp.float32,
    )
    o_ref[...] = (out_row + b2_ref[0, 0]).astype(o_ref.dtype)


def qnet_forward(state, action, params, *, batch_tile=None, operand_dtype=None):
    """Pallas-backed QNet forward.

    state: (B, S), action: (B, A) -> (B, 1) float32.
    operand_dtype: optionally cast matmul operands (e.g. jnp.bfloat16) for the
    bf16-native MXUs on v6e/v7x; accumulation stays in float32.
    """
    w1, b1, w2, b2 = params
    B, S = state.shape
    A = action.shape[1]
    H = w1.shape[1]
    assert w1.shape[0] == S + A

    # Large, 128-aligned batch tiles: amortize per-step overhead, keep the
    # output lane-dense, fill the MXU M dimension, and (for big B) give the
    # megacore scheduler >= 2 parallel steps.
    if batch_tile is None:
        batch_tile = min(512, _round_up(B, 128))
    batch_tile = _round_up(batch_tile, 128)
    B_pad = _round_up(B, batch_tile)

    if B_pad != B:
        pad = B_pad - B
        state = jnp.pad(state, ((0, pad), (0, 0)))
        action = jnp.pad(action, ((0, pad), (0, 0)))

    # Split W1 so the (B, S+A) concat never materializes in HBM.
    w1_s = w1[:S, :]
    w1_a = w1[S:, :]
    w2_row = w2.reshape(1, H)
    b1_2d = b1.reshape(1, H).astype(jnp.float32)
    b2_2d = b2.reshape(1, 1).astype(jnp.float32)

    if operand_dtype is not None:
        state = state.astype(operand_dtype)
        action = action.astype(operand_dtype)
        w1_s = w1_s.astype(operand_dtype)
        w1_a = w1_a.astype(operand_dtype)
        w2_row = w2_row.astype(operand_dtype)

    grid = (B_pad // batch_tile,)

    out_row = pl.pallas_call(
        qnet_kernel,
        out_shape=jax.ShapeDtypeStruct((1, B_pad), jnp.float32),
        grid_spec=pltpu.PrefetchScalarGridSpec(
            num_scalar_prefetch=0,
            grid=grid,
            in_specs=[
                pl.BlockSpec((batch_tile, S), lambda i: (i, 0)),   # state tile
                pl.BlockSpec((batch_tile, A), lambda i: (i, 0)),   # action tile
                pl.BlockSpec((S, H), lambda i: (0, 0)),            # W1[:S]
                pl.BlockSpec((A, H), lambda i: (0, 0)),            # W1[S:]
                pl.BlockSpec((1, H), lambda i: (0, 0)),            # b1
                pl.BlockSpec((1, H), lambda i: (0, 0)),            # w2 as a row
                pl.BlockSpec(memory_space=pltpu.MemorySpace.SMEM), # b2 scalar
            ],
            out_specs=pl.BlockSpec((1, batch_tile), lambda i: (0, i)),
        ),
        compiler_params=pltpu.CompilerParams(
            dimension_semantics=("parallel",),
        ),
    )(state, action, w1_s, w1_a, b1_2d, w2_row, b2_2d)

    # (1, B_pad) lane-dense row -> (B, 1) column (cheap wrapper-side reshape).
    return out_row.reshape(B_pad, 1)[:B]


def init_qnet_params(key, state_dim, action_dim, hidden_dim):
    """Deterministic init mimicking nn.Linear default (uniform +/- 1/sqrt(fan_in))."""
    d_in = state_dim + action_dim
    k1, k2, k3, k4 = jax.random.split(key, 4)
    bound1 = 1.0 / jnp.sqrt(d_in)
    bound2 = 1.0 / jnp.sqrt(hidden_dim)
    # Stored already transposed (in_features, out_features) so the kernel does x @ W.
    w1 = jax.random.uniform(k1, (d_in, hidden_dim), jnp.float32, -bound1, bound1)
    b1 = jax.random.uniform(k2, (hidden_dim,), jnp.float32, -bound1, bound1)
    w2 = jax.random.uniform(k3, (hidden_dim, 1), jnp.float32, -bound2, bound2)
    b2 = jax.random.uniform(k4, (1,), jnp.float32, -bound2, bound2)
    return (w1, b1, w2, b2)


def _reference(state, action, params):
    w1, b1, w2, b2 = params
    x = jnp.concatenate([state, action], axis=1)
    return jnp.maximum(x @ w1 + b1, 0.0) @ w2 + b2


if __name__ == "__main__":
    # Small shapes consistent with QNet on Hopper-like data:
    # state_dim=11, action_dim=3, num_layers=2.
    state_dim, action_dim = 11, 3

    key = jax.random.PRNGKey(0)
    k_s, k_a, k_p, k_p200 = jax.random.split(key, 4)

    # --- Case 1: tiny batch, small hidden (single grid step, one 128-row tile) ---
    hidden_dim = 32
    params = init_qnet_params(k_p, state_dim, action_dim, hidden_dim)
    batch = 8
    state = jax.random.normal(k_s, (batch, state_dim), jnp.float32)
    action = jax.random.normal(k_a, (batch, action_dim), jnp.float32)

    out = qnet_forward(state, action, params)
    out = jax.block_until_ready(out)
    ref = _reference(state, action, params)
    assert out.shape == (batch, 1)
    assert jnp.allclose(out, ref, atol=1e-5, rtol=1e-5)

    # --- Case 2: module-default hidden_dim=200, non-tile-aligned batch,
    #             multi-step parallel grid ------------------------------------
    hidden_dim2 = 200
    params200 = init_qnet_params(k_p200, state_dim, action_dim, hidden_dim2)
    batch2 = 600
    k_s2, k_a2 = jax.random.split(jax.random.PRNGKey(1), 2)
    state2 = jax.random.normal(k_s2, (batch2, state_dim), jnp.float32)
    action2 = jax.random.normal(k_a2, (batch2, action_dim), jnp.float32)

    out2 = qnet_forward(state2, action2, params200, batch_tile=256)
    out2 = jax.block_until_ready(out2)
    ref2 = _reference(state2, action2, params200)
    assert out2.shape == (batch2, 1)
    assert jnp.allclose(out2, ref2, atol=1e-5, rtol=1e-5)

    # --- Case 3: bf16 operands (v6e/v7x fast path), f32 accumulation ---------
    out3 = qnet_forward(state2, action2, params200, batch_tile=256,
                        operand_dtype=jnp.bfloat16)
    out3 = jax.block_until_ready(out3)
    assert out3.shape == (batch2, 1)
    assert jnp.allclose(out3, ref2, atol=1e-1)

    print("KERNEL_OK")
</pallas_src>

<mosaic_0001>
module attributes {stable_mosaic.version = 11 : i64} {
  func.func @qnet_kernel(%arg0: i32, %arg1: memref<128x11xf32, #tpu.memory_space<vmem>>, %arg2: memref<128x3xf32, #tpu.memory_space<vmem>>, %arg3: memref<11x32xf32, #tpu.memory_space<vmem>>, %arg4: memref<3x32xf32, #tpu.memory_space<vmem>>, %arg5: memref<1x32xf32, #tpu.memory_space<vmem>>, %arg6: memref<1x32xf32, #tpu.memory_space<vmem>>, %arg7: memref<1x1xf32, #tpu.memory_space<smem>>, %arg8: memref<1x128xf32, #tpu.memory_space<vmem>>) attributes {dimension_semantics = [#tpu.dimension_semantics<parallel>], iteration_bounds = array<i64: 1>, scalar_prefetch = 0 : i64, scratch_operands = 0 : i64, tpu.core_type = #tpu.core_type<tc>, window_params = [{transform_indices = @transform_0, window_bounds = array<i64: 128, 11>}, {transform_indices = @transform_1, window_bounds = array<i64: 128, 3>}, {pipeline_mode = #tpu.pipeline_mode<synchronous>, transform_indices = @transform_2, window_bounds = array<i64: 11, 32>}, {pipeline_mode = #tpu.pipeline_mode<synchronous>, transform_indices = @transform_3, window_bounds = array<i64: 3, 32>}, {pipeline_mode = #tpu.pipeline_mode<synchronous>, transform_indices = @transform_4, window_bounds = array<i64: 1, 32>}, {pipeline_mode = #tpu.pipeline_mode<synchronous>, transform_indices = @transform_5, window_bounds = array<i64: 1, 32>}, {transform_indices = @transform_6, window_bounds = array<i64: 1, 1>}, {transform_indices = @transform_7, window_bounds = array<i64: 1, 128>}]} {
    %c0 = arith.constant 0 : index
    %c0_0 = arith.constant 0 : index
    %0 = vector.load %arg1[%c0, %c0_0] : memref<128x11xf32, #tpu.memory_space<vmem>>, vector<128x11xf32>
    %c0_1 = arith.constant 0 : index
    %c0_2 = arith.constant 0 : index
    %1 = vector.load %arg3[%c0_1, %c0_2] : memref<11x32xf32, #tpu.memory_space<vmem>>, vector<11x32xf32>
    %cst = arith.constant dense<0.000000e+00> : vector<128x32xf32>
    %2 = tpu.matmul %0, %1, %cst {dimension_numbers = #tpu.dot_dimension_numbers<[1], [0], [0], [1], [0, 0, 1, 1], [], []>} : vector<128x11xf32>, vector<11x32xf32>, vector<128x32xf32> -> vector<128x32xf32>
    %c0_3 = arith.constant 0 : index
    %c0_4 = arith.constant 0 : index
    %3 = vector.load %arg2[%c0_3, %c0_4] : memref<128x3xf32, #tpu.memory_space<vmem>>, vector<128x3xf32>
    %c0_5 = arith.constant 0 : index
    %c0_6 = arith.constant 0 : index
    %4 = vector.load %arg4[%c0_5, %c0_6] : memref<3x32xf32, #tpu.memory_space<vmem>>, vector<3x32xf32>
    %cst_7 = arith.constant dense<0.000000e+00> : vector<128x32xf32>
    %5 = tpu.matmul %3, %4, %cst_7 {dimension_numbers = #tpu.dot_dimension_numbers<[1], [0], [0], [1], [0, 0, 1, 1], [], []>} : vector<128x3xf32>, vector<3x32xf32>, vector<128x32xf32> -> vector<128x32xf32>
    %6 = arith.addf %2, %5 : vector<128x32xf32>
    %c0_8 = arith.constant 0 : index
    %c0_9 = arith.constant 0 : index
    %7 = vector.load %arg5[%c0_8, %c0_9] : memref<1x32xf32, #tpu.memory_space<vmem>>, vector<1x32xf32>
    %8 = vector.broadcast %7 : vector<1x32xf32> to vector<128x32xf32>
    %9 = arith.addf %6, %8 : vector<128x32xf32>
    %cst_10 = arith.constant 0.000000e+00 : f32
    %10 = vector.broadcast %cst_10 : f32 to vector<128x32xf32>
    %11 = arith.maximumf %9, %10 : vector<128x32xf32>
    %c0_11 = arith.constant 0 : index
    %c0_12 = arith.constant 0 : index
    %12 = vector.load %arg6[%c0_11, %c0_12] : memref<1x32xf32, #tpu.memory_space<vmem>>, vector<1x32xf32>
    %cst_13 = arith.constant dense<0.000000e+00> : vector<1x128xf32>
    %13 = tpu.matmul %12, %11, %cst_13 {dimension_numbers = #tpu.dot_dimension_numbers<[1], [1], [0], [0], [0, 0, 1, 0], [], []>} : vector<1x32xf32>, vector<128x32xf32>, vector<1x128xf32> -> vector<1x128xf32>
    %c0_14 = arith.constant 0 : index
    %c0_15 = arith.constant 0 : index
    %14 = memref.load %arg7[%c0_14, %c0_15] : memref<1x1xf32, #tpu.memory_space<smem>>
    %15 = vector.broadcast %14 : f32 to vector<1x128xf32>
    %16 = arith.addf %13, %15 : vector<1x128xf32>
    %c0_16 = arith.constant 0 : index
    %c0_17 = arith.constant 0 : index
    %17 = vector.load %arg8[%c0_16, %c0_17] : memref<1x128xf32, #tpu.memory_space<vmem>>, vector<1x128xf32>
    tpu.vector_store %arg8[%c0_16, %c0_17], %16 {strides = array<i32>} : memref<1x128xf32, #tpu.memory_space<vmem>>, vector<1x128xf32>,
    return
  }
  func.func @transform_0(%arg0: i32) -> (i32, i32) {
    %c0_i32 = arith.constant 0 : i32
    %c0_i32_0 = arith.constant 0 : i32
    return %arg0, %c0_i32 : i32, i32
  }
  func.func @transform_1(%arg0: i32) -> (i32, i32) {
    %c0_i32 = arith.constant 0 : i32
    %c0_i32_0 = arith.constant 0 : i32
    return %arg0, %c0_i32 : i32, i32
  }
  func.func @transform_2(%arg0: i32) -> (i32, i32) {
    %c0_i32 = arith.constant 0 : i32
    %c0_i32_0 = arith.constant 0 : i32
    %c0_i32_1 = arith.constant 0 : i32
    return %c0_i32, %c0_i32_0 : i32, i32
  }
  func.func @transform_3(%arg0: i32) -> (i32, i32) {
    %c0_i32 = arith.constant 0 : i32
    %c0_i32_0 = arith.constant 0 : i32
    %c0_i32_1 = arith.constant 0 : i32
    return %c0_i32, %c0_i32_0 : i32, i32
  }
  func.func @transform_4(%arg0: i32) -> (i32, i32) {
    %c0_i32 = arith.constant 0 : i32
    %c0_i32_0 = arith.constant 0 : i32
    %c0_i32_1 = arith.constant 0 : i32
    return %c0_i32, %c0_i32_0 : i32, i32
  }
  func.func @transform_5(%arg0: i32) -> (i32, i32) {
    %c0_i32 = arith.constant 0 : i32
    %c0_i32_0 = arith.constant 0 : i32
    %c0_i32_1 = arith.constant 0 : i32
    return %c0_i32, %c0_i32_0 : i32, i32
  }
  func.func @transform_6(%arg0: i32) -> (i32, i32) {
    %c0_i32 = arith.constant 0 : i32
    %c0_i32_0 = arith.constant 0 : i32
    %c0_i32_1 = arith.constant 0 : i32
    return %c0_i32, %c0_i32_0 : i32, i32
  }
  func.func @transform_7(%arg0: i32) -> (i32, i32) {
    %c0_i32 = arith.constant 0 : i32
    %c0_i32_0 = arith.constant 0 : i32
    return %c0_i32, %arg0 : i32, i32
  }
}

</mosaic_0001>

<bundles_post_ra>
// kernel: tpu_custom_call.1
= control target key start
LH: loop header
LB: loop body
LE: loop exit
PB: predicated region body
PF: predicated region fallthrough
CT: control target
= control target key end

     0   :  { %vm112_vm0 = vcmask 1042432   ;;  %vm63_vm1 = vcmask 23552   ;;  %vm913_vm2 = vmmov 1   ;;  %s1147_s0 = inlined_call_operand.vmem [shape: f32[128,11], index: 0, kind: input, shape index: {}]   ;;  %s1148_s1 = inlined_call_operand.vmem [shape: f32[128,3], index: 1, kind: input, shape index: {}]   ;;  %s1149_s2 = inlined_call_operand.vmem [shape: f32[11,32], index: 2, kind: input, shape index: {}]   ;;  %s1150_s3 = inlined_call_operand.vmem [shape: f32[3,32], index: 3, kind: input, shape index: {}]   ;;  %s1151_s4 = inlined_call_operand.vmem [shape: f32[1,32], index: 4, kind: input, shape index: {}]   ;;  %s1152_s5 = inlined_call_operand.vmem [shape: f32[1,32], index: 5, kind: input, shape index: {}]   ;;  %s1153_s6 = inlined_call_operand.<no memory space> [shape: f32[1,1], index: 6, kind: input, shape index: {}]   ;;  %s1154_s7 = inlined_call_operand.hbm [shape: f32[1,128], index: 7, kind: output, shape index: {}]  }
   0x1   :  { %v62_v0 = vld [vmem:[%s1150_s3] sm:$0x7]  ;;  %v47_v2 = vld [vmem:[%s1148_s1 + $0x8] sm:$0xff]  ;;  %v48_v5 = vld [vmem:[%s1148_s1 + $0x10] sm:$0xff] }
   0x2   :  { %v46_v1 = vld [vmem:[%s1148_s1] sm:$0xff]  ;;  %741 = vmatprep.subr.msk.mxu0 %vm112_vm0, %v62_v0  ;;  %v45_v4 = vld [vmem:[%s1149_s2 + $0x8] sm:$0x7]  ;;  %vm831_vm3 = vmpackc.low %vm112_vm0, %vm913_vm2 }
   0x3   :  { %743 = vmatprep.mubr.msk.f32.mxu0 %vm63_vm1, %v46_v1  ;;  %v44_v3 = vld [vmem:[%s1149_s2] sm:$0xff]  ;;  %742 = vmatpush3.msk.msra.mxu0 %vm112_vm0, %v62_v0  ;;  %v49_v7 = vld [vmem:[%s1148_s1 + $0x18] sm:$0xff]  ;;  %v51_v9 = vld [vmem:[%s1148_s1 + $0x28] sm:$0xff] }
   0x4   :  { %v830_v6 = vpack.c.bf16 %v45_v4, %v44_v3  ;;  %744 = vmatmul.mubr.msk.f32.vlgmr.msra.gmra.mrb[0].mxu0 %vm63_vm1, %v47_v2  ;;  %v50_v8 = vld [vmem:[%s1148_s1 + $0x20] sm:$0xff]  ;;  %v52_v10 = vld [vmem:[%s1148_s1 + $0x30] sm:$0xff]  ;;  %v53_v11 = vld [vmem:[%s1148_s1 + $0x38] sm:$0xff] }
   0x5   :  { %746 = vmatprep.mubr.msk.f32.mxu0 %vm63_vm1, %v48_v5 }
   0x6   :  { %832 = vmatprep.subr.msk.bf16.mxu0 %vm831_vm3, %v830_v6 }
   0x7   :  { %835 = vmatpush3.bf16.msk.msra.mxu0 %vm831_vm3, %v830_v6 }
   0x8   :  { %747 = vmatmul.mubr.msk.f32.gmra.mrb[2].mxu0 %vm63_vm1, %v49_v7 }
   0x9   :  { %749 = vmatprep.mubr.msk.f32.mxu0 %vm63_vm1, %v50_v8 }
   0xc   :  { %750 = vmatmul.mubr.msk.f32.gmra.mrb[4].mxu0 %vm63_vm1, %v51_v9 }
   0xd   :  { %752 = vmatprep.mubr.msk.f32.mxu0 %vm63_vm1, %v52_v10 }
   0xe   :  { %13 = vsyncpa [#allocation4], 0  ;;  %v54_v12 = vld [vmem:[%s1148_s1 + $0x40] sm:$0xff]  ;;  %v55_v13 = vld [vmem:[%s1148_s1 + $0x48] sm:$0xff]  ;;  %vm261_vm4 = vcmask 89088   ;;  %v914_v36 = vmov 0.0|0.0  }
   0xf   :  { %v56_v14 = vld [vmem:[%s1148_s1 + $0x50] sm:$0xff]  ;;  %v57_v15 = vld [vmem:[%s1148_s1 + $0x58] sm:$0xff]  ;;  %v58_v16 = vld [vmem:[%s1148_s1 + $0x60] sm:$0xff]  ;;  %836 = vmatprep.subr.bf16.mxu1 %v914_v36  ;;  %vm915_vm5 = vmmov 0   ;;  %v916_v37 = vmov 0.0   ;;  %vm500_vm6 = vcmask 261120  }
  0x10   :  { %753 = vmatmul.mubr.msk.f32.gmra.mrb[6].mxu0 %vm63_vm1, %v53_v11  ;;  %v59_v17 = vld [vmem:[%s1148_s1 + $0x68] sm:$0xff]  ;;  %v60_v18 = vld [vmem:[%s1148_s1 + $0x70] sm:$0xff]  ;;  %v61_v19 = vld [vmem:[%s1148_s1 + $0x78] sm:$0xff]  ;;  %827 = vmatprep.mubr.msk.f32.mxu1 %vm915_vm5, %v916_v37  ;;  %s917_s21 = smov [#allocation3]  }
  0x11   :  { %755 = vmatprep.mubr.msk.f32.mxu0 %vm63_vm1, %v54_v12  ;;  %v28_v20 = vld [vmem:[%s1147_s0] sm:$0xff]  ;;  %v29_v21 = vld [vmem:[%s1147_s0 + $0x8] sm:$0xff]  ;;  %v30_v22 = vld [vmem:[%s1147_s0 + $0x10] sm:$0xff]  ;;  %s629_s22 = sshll.u32 %s917_s21, 4  ;;  %s630_s22 = int_to_ptr.vmem [resolvable:$true] %s629_s22 }
  0x12   :  { %v31_v23 = vld [vmem:[%s1147_s0 + $0x18] sm:$0xff]  ;;  %v32_v24 = vld [vmem:[%s1147_s0 + $0x20] sm:$0xff]  ;;  %v33_v25 = vld [vmem:[%s1147_s0 + $0x28] sm:$0xff]  ;;  %s889_s23 = scalar_lea.vmem %s630_s22, 16  ;;  %s893_s24 = scalar_lea.vmem %s630_s22, 32 }
  0x13   :  { %v34_v26 = vld [vmem:[%s1147_s0 + $0x30] sm:$0xff]  ;;  %v35_v27 = vld [vmem:[%s1147_s0 + $0x38] sm:$0xff]  ;;  %v36_v28 = vld [vmem:[%s1147_s0 + $0x40] sm:$0xff]  ;;  %p890_p0 = scmp.ne.s32.totalorder %s630_s22, %s889_s23  ;;  %p894_p1 = scmp.lt.s32.totalorder %s630_s22, %s630_s22 }
  0x14   :  { %756 = vmatmul.mubr.msk.f32.gmra.mrb[8].mxu0 %vm63_vm1, %v55_v13  ;;  %v37_v29 = vld [vmem:[%s1147_s0 + $0x48] sm:$0xff]  ;;  %v38_v30 = vld [vmem:[%s1147_s0 + $0x50] sm:$0xff]  ;;  %v39_v31 = vld [vmem:[%s1147_s0 + $0x58] sm:$0xff]  ;;  %p895_p2 = scmp.lt.s32.totalorder %s893_s24, %s889_s23 }
  0x15   :  { %758 = vmatprep.mubr.msk.f32.mxu0 %vm63_vm1, %v56_v14  ;;  %v40_v32 = vld [vmem:[%s1147_s0 + $0x60] sm:$0xff]  ;;  %v41_v33 = vld [vmem:[%s1147_s0 + $0x68] sm:$0xff]  ;;  %v42_v34 = vld [vmem:[%s1147_s0 + $0x70] sm:$0xff] }
  0x16   :  { %v43_v35 = vld [vmem:[%s1147_s0 + $0x78] sm:$0xff]  ;;  %v671_v38 = vld [vmem:[%s1151_s4] ss:$0 sm:$0xff]  ;;  %vm1101_vm7 = vmpackc.low %vm500_vm6, %vm500_vm6  ;;  %p896_p3 = por %p895_p2, %p894_p1 }
  0x18   :  { %759 = vmatmul.mubr.msk.f32.gmra.mrb[10].mxu0 %vm63_vm1, %v57_v15  ;;  %p897_p4 = pnand %p896_p3, %p890_p0 }
  0x19   :  { %761 = vmatprep.mubr.msk.f32.mxu0 %vm63_vm1, %v58_v16 }
  0x1c   :  { %762 = vmatmul.mubr.msk.f32.gmra.mrb[12].mxu0 %vm63_vm1, %v59_v17 }
  0x1d   :  { %764 = vmatprep.mubr.msk.f32.mxu0 %vm63_vm1, %v60_v18 }
  0x20   :  { %765 = vmatmul.mubr.msk.f32.gmra.mrb[14].mxu0 %vm63_vm1, %v61_v19 }
  0x21   :  { %771 = vmatprep.mubr.msk.f32.mxu0 %vm261_vm4, %v28_v20 }
  0x24   :  { %772 = vmatmul.mubr.msk.f32.vlgmr.msra.gmra.mrb[0].mxu0 %vm261_vm4, %v29_v21 }
  0x25   :  { %774 = vmatprep.mubr.msk.f32.mxu0 %vm261_vm4, %v30_v22 }
  0x28   :  { %775 = vmatmul.mubr.msk.f32.gmra.mrb[2].mxu0 %vm261_vm4, %v31_v23 }
  0x29   :  { %777 = vmatprep.mubr.msk.f32.mxu0 %vm261_vm4, %v32_v24 }
  0x2c   :  { %778 = vmatmul.mubr.msk.f32.gmra.mrb[4].mxu0 %vm261_vm4, %v33_v25 }
  0x2d   :  { %780 = vmatprep.mubr.msk.f32.mxu0 %vm261_vm4, %v34_v26 }
  0x30   :  { %781 = vmatmul.mubr.msk.f32.gmra.mrb[6].mxu0 %vm261_vm4, %v35_v27 }
  0x31   :  { %783 = vmatprep.mubr.msk.f32.mxu0 %vm261_vm4, %v36_v28 }
  0x34   :  { %784 = vmatmul.mubr.msk.f32.gmra.mrb[8].mxu0 %vm261_vm4, %v37_v29 }
  0x35   :  { %786 = vmatprep.mubr.msk.f32.mxu0 %vm261_vm4, %v38_v30 }
  0x38   :  { %787 = vmatmul.mubr.msk.f32.gmra.mrb[10].mxu0 %vm261_vm4, %v39_v31 }
  0x39   :  { %789 = vmatprep.mubr.msk.f32.mxu0 %vm261_vm4, %v40_v32  ;;  %v497_v32 = vld [vmem:[%s1152_s5] sm:$0x1] }
  0x3c   :  { %790 = vmatmul.mubr.msk.f32.gmra.mrb[12].mxu0 %vm261_vm4, %v41_v33  ;;  %v499_v33 = vstv %s1153_s6 }
  0x3d   :  { %792 = vmatprep.mubr.msk.f32.mxu0 %vm261_vm4, %v42_v34 }
  0x40   :  { %793 = vmatmul.mubr.msk.f32.gmra.mrb[14].mxu0 %vm261_vm4, %v43_v35 }
  0xf7   :  { %v773_v39 = vpop.f32.mrb[0].mxu0 }
  0xf8   :  { %v466_v40 = vadd.f32 %v773_v39, %v671_v38  ;;  %v379_v41 = vpop.f32.mrb[1].mxu0 }
  0xf9   :  { %v465_v42 = vadd.f32 %v671_v38, %v379_v41 }
  0xfa   :  { %v482_v43 = vmax.f32 %v466_v40, 0.0 }
  0xfb   :  { %v481_v44 = vmax.f32 %v465_v42, 0.0  ;;  %v776_v45 = vpop.f32.mrb[2].mxu0 }
  0xfc   :  { %v468_v46 = vadd.f32 %v776_v45, %v671_v38  ;;  %v389_v47 = vpop.f32.mrb[3].mxu0 }
  0xfd   :  { %v837_v49 = vpack.c.bf16 %v482_v43, %v481_v44  ;;  %v467_v50 = vadd.f32 %v671_v38, %v389_v47 }
  0xfe   :  { %v484_v51 = vmax.f32 %v468_v46, 0.0 }
  0xff   :  { %v483_v52 = vmax.f32 %v467_v50, 0.0  ;;  %v779_v53 = vpop.f32.mrb[4].mxu0  ;;  %839 = vmatpush3.bf16.xpose.msk.msra.mxu1 %vm1101_vm7, %v837_v49 }
 0x100   :  { %v470_v54 = vadd.f32 %v779_v53, %v671_v38  ;;  %v399_v55 = vpop.f32.mrb[5].mxu0  ;;  %840 = vmatprep.subr.bf16.mxu1 %v914_v36 }
 0x101   :  { %v841_v56 = vpack.c.bf16 %v484_v51, %v483_v52  ;;  %v469_v57 = vadd.f32 %v671_v38, %v399_v55 }
 0x102   :  { %v486_v58 = vmax.f32 %v470_v54, 0.0 }
 0x103   :  { %v485_v59 = vmax.f32 %v469_v57, 0.0  ;;  %v782_v60 = vpop.f32.mrb[6].mxu0 }
 0x104   :  { %v472_v61 = vadd.f32 %v782_v60, %v671_v38  ;;  %v409_v62 = vpop.f32.mrb[7].mxu0 }
 0x105   :  { %v845_v63 = vpack.c.bf16 %v486_v58, %v485_v59  ;;  %v471_v0 = vadd.f32 %v671_v38, %v409_v62 }
 0x106   :  { %v488_v1 = vmax.f32 %v472_v61, 0.0 }
 0x107   :  { %v487_v2 = vmax.f32 %v471_v0, 0.0  ;;  %v785_v3 = vpop.f32.mrb[8].mxu0  ;;  %843 = vmatpush3.bf16.xpose.msk.msra.mxu1 %vm1101_vm7, %v841_v56 }
 0x108   :  { %v474_v4 = vadd.f32 %v785_v3, %v671_v38  ;;  %v419_v5 = vpop.f32.mrb[9].mxu0  ;;  %844 = vmatprep.subr.bf16.mxu1 %v914_v36 }
 0x109   :  { %v849_v6 = vpack.c.bf16 %v488_v1, %v487_v2  ;;  %v473_v7 = vadd.f32 %v671_v38, %v419_v5 }
 0x10a   :  { %v490_v8 = vmax.f32 %v474_v4, 0.0 }
 0x10b   :  { %v489_v9 = vmax.f32 %v473_v7, 0.0  ;;  %v788_v10 = vpop.f32.mrb[10].mxu0 }
 0x10c   :  { %v476_v11 = vadd.f32 %v788_v10, %v671_v38  ;;  %v429_v12 = vpop.f32.mrb[11].mxu0 }
 0x10d   :  { %v853_v13 = vpack.c.bf16 %v490_v8, %v489_v9  ;;  %v475_v14 = vadd.f32 %v671_v38, %v429_v12 }
 0x10e   :  { %v492_v15 = vmax.f32 %v476_v11, 0.0 }
 0x10f   :  { %v491_v16 = vmax.f32 %v475_v14, 0.0  ;;  %v791_v17 = vpop.f32.mrb[12].mxu0  ;;  %847 = vmatpush3.bf16.xpose.msk.msra.mxu1 %vm1101_vm7, %v845_v63 }
 0x110   :  { %v478_v18 = vadd.f32 %v791_v17, %v671_v38  ;;  %v439_v19 = vpop.f32.mrb[13].mxu0  ;;  %848 = vmatprep.subr.bf16.mxu1 %v914_v36 }
 0x111   :  { %v857_v20 = vpack.c.bf16 %v492_v15, %v491_v16  ;;  %v477_v21 = vadd.f32 %v671_v38, %v439_v19 }
 0x112   :  { %v494_v22 = vmax.f32 %v478_v18, 0.0 }
 0x113   :  { %v493_v23 = vmax.f32 %v477_v21, 0.0  ;;  %v794_v24 = vpop.f32.mrb[14].mxu0 }
 0x114   :  { %v480_v25 = vadd.f32 %v794_v24, %v671_v38  ;;  %v449_v26 = vpop.f32.mrb[15].mxu0 }
 0x115   :  { %v861_v27 = vpack.c.bf16 %v494_v22, %v493_v23  ;;  %v479_v28 = vadd.f32 %v671_v38, %v449_v26 }
 0x116   :  { %v496_v29 = vmax.f32 %v480_v25, 0.0 }
 0x117   :  { %v495_v30 = vmax.f32 %v479_v28, 0.0  ;;  %851 = vmatpush3.bf16.xpose.msk.msra.mxu1 %vm1101_vm7, %v849_v6 }
 0x118   :  { %852 = vmatprep.subr.bf16.mxu1 %v914_v36 }
 0x119   :  { %v865_v31 = vpack.c.bf16 %v496_v29, %v495_v30 }
 0x11f   :  { %855 = vmatpush3.bf16.xpose.msk.msra.mxu1 %vm1101_vm7, %v853_v13 }
 0x120   :  { %856 = vmatprep.subr.bf16.mxu1 %v914_v36 }
 0x127   :  { %859 = vmatpush3.bf16.xpose.msk.msra.mxu1 %vm1101_vm7, %v857_v20 }
 0x128   :  { %860 = vmatprep.subr.bf16.mxu1 %v914_v36 }
 0x12f   :  { %863 = vmatpush3.bf16.xpose.msk.msra.mxu1 %vm1101_vm7, %v861_v27 }
 0x130   :  { %864 = vmatprep.subr.bf16.mxu1 %v914_v36 }
 0x137   :  { %867 = vmatpush3.bf16.xpose.msk.msra.mxu1 %vm1101_vm7, %v865_v31 }
 0x13e   :  { %828 = vmatmul.mubr.msk.f32.vlgmr.msra.gmra.mrb[0].mxu1 %vm500_vm6, %v497_v32 }
 0x211   :  { %v618_v34 = vpop.f32.mrb[0].mxu1 }
 0x212   :  { %v619_v35 = vadd.f32 %v618_v34, %v499_v33  ;;  %v829_v37 = vpop.f32.mrb[1].mxu1 }
 0x214   :  { %622 = vst [vmem:[#allocation3] sm:$0x1] %v619_v35 }
 0x215   :  { %900 = shalt.err (!%p897_p4)
}
 0x216   :  { %s901_s26 = scalar_lea.hbm %s1154_s7, 16 }
 0x217   :  { %p902_p5 = scmp.ne.s32.totalorder %s1154_s7, %s901_s26  ;;  %p905_p6 = scmp.lt.u32.totalorder %s901_s26, %s1154_s7 }
 0x219   :  { %p907_p7 = pnand %p905_p6, %p902_p5 }
 0x21b   :  { %910 = shalt.err (!%p907_p7)
}
 0x21c   :  { %632 = dma.vmem_to_hbm [thread:$0]  %s630_s22, 16, %s1154_s7, [#allocation4]  }
 0x21d   :  { %911 = dma.done.wait [#allocation4], 16  }
 0x21e   :  { %912 = vsyncadd [#allocation4], 4294967280 }
 0x21f   :  { %636 = vsyncpa [#allocation4], 1 }

</bundles_post_ra>
